<compile_context>
chip_gen: v7x
topology: tpu7x:2x2x1
jax: 0.10.0
libtpu: 0.0.40
codegen_flags: <defaults>
</compile_context>

<pallas_src>
import math
import jax
import jax.numpy as jnp
from jax.experimental import pallas as pl
from jax.experimental.pallas import tpu as pltpu

VOCAB = 1536
_INV_SQRT2 = 1.0 / math.sqrt(2.0)


def _make_kernel(eps: float, matmul_dtype):
    def head_kernel(x_ref, w1_ref, b1_ref, w2_ref, b2_ref, o_ref, h_scratch):
        # Transform phase: run once per row tile (at the first vocab tile).
        # The result persists in VMEM scratch across the (sequential) vocab
        # axis for this row tile.
        @pl.when(pl.program_id(1) == 0)
        def _():
            x = x_ref[...]
            w1 = w1_ref[...]
            if matmul_dtype is not None:
                x = x.astype(matmul_dtype)
                w1 = w1.astype(matmul_dtype)
            h = jnp.dot(x, w1, preferred_element_type=jnp.float32) + b1_ref[...]
            # erf-based gelu (matches the reference `gelu`)
            h = h * 0.5 * (1.0 + jax.lax.erf(h * _INV_SQRT2))
            # LayerNorm over the last axis (gamma/beta folded into w2/b2).
            mean = jnp.mean(h, axis=-1, keepdims=True)
            var = jnp.mean(jnp.square(h - mean), axis=-1, keepdims=True)
            h_scratch[...] = (h - mean) * jax.lax.rsqrt(var + eps)

        # Decoder matmul for this (row tile, vocab tile).
        h = h_scratch[...]
        w2 = w2_ref[...]
        if matmul_dtype is not None:
            h = h.astype(matmul_dtype)
            w2 = w2.astype(matmul_dtype)
        o_ref[...] = (jnp.dot(h, w2, preferred_element_type=jnp.float32)
                      + b2_ref[...]).astype(o_ref.dtype)

    return head_kernel


def _round_up(x: int, m: int) -> int:
    return ((x + m - 1) // m) * m


def visual_lm_prediction_head(x, params, *, eps=1e-12, tm=256, tn=512,
                              matmul_dtype=None):
    """x: (B, S, H) float32.  Returns (B, S, VOCAB) float32.

    matmul_dtype: set to jnp.bfloat16 on v6e/v7x for ~3x MXU throughput
    (accumulation stays f32).  Default None keeps full f32 precision.
    """
    B, S, H = x.shape
    M = B * S
    x2d = x.reshape(M, H)

    # Tile sizes: align the row tile to 8 sublanes; pad M up to a multiple.
    tm = min(tm, _round_up(M, 8))
    M_pad = _round_up(M, tm)
    if M_pad != M:
        x2d = jnp.pad(x2d, ((0, M_pad - M), (0, 0)))
    assert VOCAB % tn == 0 and tn % 128 == 0

    w1 = params["w1"]                      # (H, H)   (in, out)
    b1 = params["b1"].reshape(1, H)        # (1, H)
    gamma = params["gamma"]                # (H,)
    beta = params["beta"]                  # (H,)
    # Fold LayerNorm's affine into the decoder:
    #   (h_norm * gamma + beta) @ W2 + b2 == h_norm @ (diag(gamma) W2) + (beta @ W2 + b2)
    w2 = gamma[:, None] * params["w2"]                          # (H, VOCAB)
    b2 = (beta @ params["w2"] + params["b2"]).reshape(1, VOCAB)  # (1, VOCAB)

    grid = (M_pad // tm, VOCAB // tn)

    # VMEM budget (f32, double-buffered inputs/outputs + scratch) -> explicit
    # limit with headroom; stays well under v7x's 64 MiB for default tiles.
    est = 4 * (2 * tm * H + 2 * H * H + 2 * H + 2 * H * tn + 2 * tn
               + 2 * tm * tn + tm * H)
    vmem_limit = min(max(int(est * 1.5), 16 * 1024 * 1024), 48 * 1024 * 1024)

    cost = pl.CostEstimate(
        flops=2 * M_pad * H * H + 2 * M_pad * H * VOCAB,
        transcendentals=M_pad * H,                     # erf
        bytes_accessed=4 * (M_pad * H + H * H + H * VOCAB + H + VOCAB
                            + M_pad * VOCAB))

    out2d = pl.pallas_call(
        _make_kernel(eps, matmul_dtype),
        out_shape=jax.ShapeDtypeStruct((M_pad, VOCAB), jnp.float32),
        grid_spec=pltpu.PrefetchScalarGridSpec(
            num_scalar_prefetch=0,
            grid=grid,
            in_specs=[
                pl.BlockSpec((tm, H), lambda i, j: (i, 0)),    # x row tile
                pl.BlockSpec((H, H), lambda i, j: (0, 0)),     # w1
                pl.BlockSpec((1, H), lambda i, j: (0, 0)),     # b1
                pl.BlockSpec((H, tn), lambda i, j: (0, j)),    # w2 vocab tile
                pl.BlockSpec((1, tn), lambda i, j: (0, j)),    # b2 vocab tile
            ],
            out_specs=pl.BlockSpec((tm, tn), lambda i, j: (i, j)),
            scratch_shapes=[pltpu.VMEM((tm, H), jnp.float32)],
        ),
        compiler_params=pltpu.CompilerParams(
            dimension_semantics=("parallel", "arbitrary"),
            vmem_limit_bytes=vmem_limit),
        cost_estimate=cost,
    )(x2d, w1, b1, w2, b2)

    if M_pad != M:
        out2d = out2d[:M]
    return out2d.reshape(B, S, VOCAB)


def reference(x, params, eps=1e-12):
    B, S, H = x.shape
    h = x.reshape(B * S, H) @ params["w1"] + params["b1"]
    h = h * 0.5 * (1.0 + jax.lax.erf(h / math.sqrt(2.0)))
    mean = jnp.mean(h, axis=-1, keepdims=True)
    var = jnp.mean(jnp.square(h - mean), axis=-1, keepdims=True)
    h = (h - mean) * jax.lax.rsqrt(var + eps)
    h = h * params["gamma"] + params["beta"]
    y = h @ params["w2"] + params["b2"]
    return y.reshape(B, S, VOCAB)


if __name__ == "__main__":
    B, S, H = 2, 8, 32
    key = jax.random.PRNGKey(0)
    kx, kw1, kb1, kw2 = jax.random.split(key, 4)

    x = jax.random.normal(kx, (B, S, H), dtype=jnp.float32)

    # Deterministic synthetic parameters (shapes per module __init__):
    #   transform.dense:  Linear(H, H)         -> w1 (H, H), b1 (H,)
    #   transform.LayerNorm(H)                 -> gamma (H,) ones, beta (H,) zeros
    #   decoder: Linear(H, 1536, bias=False)   -> w2 (H, 1536)
    #   bias:    zeros(1536) (tied to decoder.bias)
    params = {
        "w1": jax.random.normal(kw1, (H, H), dtype=jnp.float32) * 0.05,
        "b1": jax.random.normal(kb1, (H,), dtype=jnp.float32) * 0.05,
        "gamma": jnp.ones((H,), dtype=jnp.float32),
        "beta": jnp.zeros((H,), dtype=jnp.float32),
        "w2": jax.random.normal(kw2, (H, VOCAB), dtype=jnp.float32) * 0.05,
        "b2": jnp.zeros((VOCAB,), dtype=jnp.float32),
    }

    y = visual_lm_prediction_head(x, params)
    y = jax.block_until_ready(y)

    y_ref = reference(x, params)
    assert y.shape == (B, S, VOCAB)
    assert jnp.allclose(y, y_ref, atol=1e-4, rtol=1e-4)
    print("KERNEL_OK")
</pallas_src>

<mosaic_0001>
module attributes {stable_mosaic.version = 11 : i64} {
  func.func @head_kernel(%arg0: i32, %arg1: i32, %arg2: memref<16x32xf32, #tpu.memory_space<vmem>>, %arg3: memref<32x32xf32, #tpu.memory_space<vmem>>, %arg4: memref<1x32xf32, #tpu.memory_space<vmem>>, %arg5: memref<32x512xf32, #tpu.memory_space<vmem>>, %arg6: memref<1x512xf32, #tpu.memory_space<vmem>>, %arg7: memref<16x512xf32, #tpu.memory_space<vmem>>, %arg8: memref<16x32xf32, #tpu.memory_space<vmem>>) attributes {dimension_semantics = [#tpu.dimension_semantics<parallel>, #tpu.dimension_semantics<arbitrary>], iteration_bounds = array<i64: 1, 3>, scalar_prefetch = 0 : i64, scratch_operands = 1 : i64, tpu.core_type = #tpu.core_type<tc>, window_params = [{transform_indices = @transform_0, window_bounds = array<i64: 16, 32>}, {pipeline_mode = #tpu.pipeline_mode<synchronous>, transform_indices = @transform_1, window_bounds = array<i64: 32, 32>}, {pipeline_mode = #tpu.pipeline_mode<synchronous>, transform_indices = @transform_2, window_bounds = array<i64: 1, 32>}, {transform_indices = @transform_3, window_bounds = array<i64: 32, 512>}, {transform_indices = @transform_4, window_bounds = array<i64: 1, 512>}, {transform_indices = @transform_5, window_bounds = array<i64: 16, 512>}]} {
    %c0_i32 = arith.constant 0 : i32
    %0 = arith.cmpi eq, %arg1, %c0_i32 : i32
    %1 = arith.extui %0 : i1 to i32
    %c0_i32_0 = arith.constant 0 : i32
    %2 = arith.cmpi ne, %1, %c0_i32_0 : i32
    scf.if %2 {
      %c0_8 = arith.constant 0 : index
      %c0_9 = arith.constant 0 : index
      %10 = vector.load %arg2[%c0_8, %c0_9] : memref<16x32xf32, #tpu.memory_space<vmem>>, vector<16x32xf32>
      %c0_10 = arith.constant 0 : index
      %c0_11 = arith.constant 0 : index
      %11 = vector.load %arg3[%c0_10, %c0_11] : memref<32x32xf32, #tpu.memory_space<vmem>>, vector<32x32xf32>
      %cst_12 = arith.constant dense<0.000000e+00> : vector<16x32xf32>
      %12 = tpu.matmul %10, %11, %cst_12 {dimension_numbers = #tpu.dot_dimension_numbers<[1], [0], [0], [1], [0, 0, 1, 1], [], []>} : vector<16x32xf32>, vector<32x32xf32>, vector<16x32xf32> -> vector<16x32xf32>
      %c0_13 = arith.constant 0 : index
      %c0_14 = arith.constant 0 : index
      %13 = vector.load %arg4[%c0_13, %c0_14] : memref<1x32xf32, #tpu.memory_space<vmem>>, vector<1x32xf32>
      %14 = vector.broadcast %13 : vector<1x32xf32> to vector<16x32xf32>
      %15 = arith.addf %12, %14 : vector<16x32xf32>
      %cst_15 = arith.constant 5.000000e-01 : f32
      %16 = vector.broadcast %cst_15 : f32 to vector<16x32xf32>
      %17 = arith.mulf %15, %16 : vector<16x32xf32>
      %cst_16 = arith.constant 0.707106769 : f32
      %18 = vector.broadcast %cst_16 : f32 to vector<16x32xf32>
      %19 = arith.mulf %15, %18 : vector<16x32xf32>
      %20 = math.erf %19 : vector<16x32xf32>
      %cst_17 = arith.constant 1.000000e+00 : f32
      %21 = vector.broadcast %cst_17 : f32 to vector<16x32xf32>
      %22 = arith.addf %21, %20 : vector<16x32xf32>
      %23 = arith.mulf %17, %22 : vector<16x32xf32>
      %cst_18 = arith.constant dense<0.000000e+00> : vector<16xf32>
      %24 = vector.multi_reduction <add>, %23, %cst_18 [1] : vector<16x32xf32> to vector<16xf32>
      %25 = vector.shape_cast %24 : vector<16xf32> to vector<16x1xf32>
      %cst_19 = arith.constant 3.200000e+01 : f32
      %26 = vector.broadcast %cst_19 : f32 to vector<16x1xf32>
      %27 = arith.divf %25, %26 : vector<16x1xf32>
      %28 = vector.broadcast %27 : vector<16x1xf32> to vector<16x32xf32>
      %29 = arith.subf %23, %28 : vector<16x32xf32>
      %30 = arith.mulf %29, %29 : vector<16x32xf32>
      %cst_20 = arith.constant dense<0.000000e+00> : vector<16xf32>
      %31 = vector.multi_reduction <add>, %30, %cst_20 [1] : vector<16x32xf32> to vector<16xf32>
      %32 = vector.shape_cast %31 : vector<16xf32> to vector<16x1xf32>
      %cst_21 = arith.constant 3.200000e+01 : f32
      %33 = vector.broadcast %cst_21 : f32 to vector<16x1xf32>
      %34 = arith.divf %32, %33 : vector<16x1xf32>
      %35 = vector.broadcast %27 : vector<16x1xf32> to vector<16x32xf32>
      %36 = arith.subf %23, %35 : vector<16x32xf32>
      %cst_22 = arith.constant 9.99999996E-13 : f32
      %37 = vector.broadcast %cst_22 : f32 to vector<16x1xf32>
      %38 = arith.addf %34, %37 : vector<16x1xf32>
      %39 = math.rsqrt %38 : vector<16x1xf32>
      %40 = vector.broadcast %39 : vector<16x1xf32> to vector<16x32xf32>
      %41 = arith.mulf %36, %40 : vector<16x32xf32>
      %c0_23 = arith.constant 0 : index
      %c0_24 = arith.constant 0 : index
      %42 = vector.load %arg8[%c0_23, %c0_24] : memref<16x32xf32, #tpu.memory_space<vmem>>, vector<16x32xf32>
      tpu.vector_store %arg8[%c0_23, %c0_24], %41 {strides = array<i32>} : memref<16x32xf32, #tpu.memory_space<vmem>>, vector<16x32xf32>,
    } else {
    }
    %c0 = arith.constant 0 : index
    %c0_1 = arith.constant 0 : index
    %3 = vector.load %arg8[%c0, %c0_1] : memref<16x32xf32, #tpu.memory_space<vmem>>, vector<16x32xf32>
    %c0_2 = arith.constant 0 : index
    %c0_3 = arith.constant 0 : index
    %4 = vector.load %arg5[%c0_2, %c0_3] : memref<32x512xf32, #tpu.memory_space<vmem>>, vector<32x512xf32>
    %cst = arith.constant dense<0.000000e+00> : vector<16x512xf32>
    %5 = tpu.matmul %3, %4, %cst {dimension_numbers = #tpu.dot_dimension_numbers<[1], [0], [0], [1], [0, 0, 1, 1], [], []>} : vector<16x32xf32>, vector<32x512xf32>, vector<16x512xf32> -> vector<16x512xf32>
    %c0_4 = arith.constant 0 : index
    %c0_5 = arith.constant 0 : index
    %6 = vector.load %arg6[%c0_4, %c0_5] : memref<1x512xf32, #tpu.memory_space<vmem>>, vector<1x512xf32>
    %7 = vector.broadcast %6 : vector<1x512xf32> to vector<16x512xf32>
    %8 = arith.addf %5, %7 : vector<16x512xf32>
    %c0_6 = arith.constant 0 : index
    %c0_7 = arith.constant 0 : index
    %9 = vector.load %arg7[%c0_6, %c0_7] : memref<16x512xf32, #tpu.memory_space<vmem>>, vector<16x512xf32>
    tpu.vector_store %arg7[%c0_6, %c0_7], %8 {strides = array<i32>} : memref<16x512xf32, #tpu.memory_space<vmem>>, vector<16x512xf32>,
    return
  }
  func.func @transform_0(%arg0: i32, %arg1: i32) -> (i32, i32) {
    %c0_i32 = arith.constant 0 : i32
    %c0_i32_0 = arith.constant 0 : i32
    return %arg0, %c0_i32 : i32, i32
  }
  func.func @transform_1(%arg0: i32, %arg1: i32) -> (i32, i32) {
    %c0_i32 = arith.constant 0 : i32
    %c0_i32_0 = arith.constant 0 : i32
    %c0_i32_1 = arith.constant 0 : i32
    return %c0_i32, %c0_i32_0 : i32, i32
  }
  func.func @transform_2(%arg0: i32, %arg1: i32) -> (i32, i32) {
    %c0_i32 = arith.constant 0 : i32
    %c0_i32_0 = arith.constant 0 : i32
    %c0_i32_1 = arith.constant 0 : i32
    return %c0_i32, %c0_i32_0 : i32, i32
  }
  func.func @transform_3(%arg0: i32, %arg1: i32) -> (i32, i32) {
    %c0_i32 = arith.constant 0 : i32
    %c0_i32_0 = arith.constant 0 : i32
    return %c0_i32, %arg1 : i32, i32
  }
  func.func @transform_4(%arg0: i32, %arg1: i32) -> (i32, i32) {
    %c0_i32 = arith.constant 0 : i32
    %c0_i32_0 = arith.constant 0 : i32
    return %c0_i32, %arg1 : i32, i32
  }
  func.func @transform_5(%arg0: i32, %arg1: i32) -> (i32, i32) {
    %c0_i32 = arith.constant 0 : i32
    return %arg0, %arg1 : i32, i32
  }
}

</mosaic_0001>

<bundles_post_ra>
// kernel: tpu_custom_call.1
= control target key start
LH: loop header
LB: loop body
LE: loop exit
PB: predicated region body
PF: predicated region fallthrough
CT: control target
= control target key end

     0   :  { %10 = vsyncpa [#allocation4], 0  ;;  %s1497_s0 = inlined_call_operand.hbm [shape: f32[16,32], index: 0, kind: input, shape index: {}]   ;;  %s1498_s1 = inlined_call_operand.hbm [shape: f32[32,32], index: 1, kind: input, shape index: {}]   ;;  %s1499_s2 = inlined_call_operand.vmem [shape: f32[1,32], index: 2, kind: input, shape index: {}]   ;;  %s1500_s3 = inlined_call_operand.hbm [shape: f32[32,1536], index: 3, kind: input, shape index: {}]   ;;  %s1501_s4 = inlined_call_operand.vmem [shape: f32[1,1536], index: 4, kind: input, shape index: {}]   ;;  %s1502_s5 = inlined_call_operand.hbm [shape: f32[16,1536], index: 5, kind: output, shape index: {}]  }
   0x1   :  { %11 = vsyncpa [#allocation7], 0 }
   0x2   :  { %12 = vsyncpa [#allocation5], 0 }
   0x3   :  { %14 = vsyncpa [#allocation5 + $0x1], 0  ;;  %s1185_s18 = smov 0   ;;  %s1187_s19 = smov 0  }
   0x4   :  { %s1189_s20 = smov 0   ;;  %s1191_s21 = smov 0  }
   0x5   :  { %s1193_s22 = smov 0   ;;  %s1195_s23 = smov 0  }
   0x6 LB: > { %s1216_s24 = sadd.s32 4294967295, %s1140_s23   ;;  %s794_s25 = sadd.s32 4294967294, %s1140_s23   ;;  %s1140_s23 = sphi %s1195_s23, %s20_s23   ;;  %s1136_s22 = sphi %s1193_s22, %s1528_s22   ;;  %s1132_s21 = sphi %s1191_s21, %s1527_s21   ;;  %s1128_s20 = sphi %s1189_s20, %s1526_s20   ;;  %s1124_s19 = sphi %s1187_s19, %s1525_s19   ;;  %s1120_s18 = sphi %s1185_s18, %s1524_s18  }
   0x7   : > { %p114_p0 = scmp.ne.s32.totalorder %s1128_s20, %s1124_s19  ;;  %p115_p1 = scmp.eq.s32.totalorder %s1140_s23, 0 }
   0x8   : > { %p120_p2 = scmp.ne.s32.totalorder %s1124_s19, %s1120_s18  ;;  %p1503_p3 = scmp.eq.s32.totalorder %s1216_s24, 0 }
   0x9   : > { %p172_p4 = scmp.eq.s32.totalorder %s1216_s24, 2  ;;  %p1227_p5 = por %p115_p1, %p114_p0 }
   0xa   : > { %p178_p6 = scmp.eq.s32.totalorder %s794_s25, 2  ;;  %p1233_p7 = por %p1503_p3, %p120_p2 }
   0xb   : > { %p1237_p8 = por %p172_p4, %p114_p0  ;;  %p795_p10 = scmp.ge.s32.totalorder %s1140_s23, 1 }
   0xc   : > { %s1508_s28 = scalar_select %p1233_p7, 1, 0 }
   0xd   : > { %s1509_s29 = scalar_select %p1237_p8, 1, 0 }
   0xe   : > { %p1241_p9 = por %p178_p6, %p120_p2  ;;  %p185_p11 = scmp.lt.s32.totalorder %s1140_s23, 4 }
   0xf   : > { %s1142_s7 = smov [#allocation3]   ;;  %p893_p0 = scmp.lt.s32.totalorder %s1140_s23, 3 }
  0x10   : > { %s1510_s30 = scalar_select %p1241_p9, 1, 0 }
  0x11   : > { %p1247_p12 = pnand %p795_p10, %p185_p11  ;;  %s200_s8 = sshll.u32 %s1142_s7, 4  ;;  %s1251_s8 = int_to_ptr.vmem [resolvable:$true] %s200_s8 }
  0x12   : > { %1511 = sst [smem:[#allocation14_spill]] %s1510_s30  ;;  %s1143_s10 = smov [#allocation6]  }
  0x13   : > { %p876_p13 = pneg %p1247_p12  ;;  %s213_s11 = sshll.u32 %s1143_s10, 4  ;;  %s1268_s11 = int_to_ptr.vmem [resolvable:$true] %s213_s11 }
  0x14   : > { %p1264_p2 = pnand %p893_p0, %p1227_p5  ;;  %s964_s15 = scalar_lea.hbm %s1497_s0, 256 }
  0x15   : > { %p1258_p1 = pnand %p876_p13, %p1503_p3  ;;  %p965_p4 = scmp.ne.s32.totalorder %s1497_s0, %s964_s15 }
  0x16   : > { %p971_p5 = scmp.lt.u32.totalorder %s964_s15, %s1497_s0 }
  0x17   : > { %p966_p6 = pneg %p1258_p1 }
  0x19   : > { %p967_p10 = pnand %p966_p6, %p965_p4 }
  0x1b   : > { %p968_p11 = pneg %p967_p10 }
  0x1d   : > { %p973_p13 = pnand %p971_p5, %p968_p11 }
  0x1f   : > { %976 = shalt.err (!%p973_p13)
}
  0x20   : > { %s977_s7 = scalar_lea.vmem %s1251_s8, 256  ;;  %p985_p8 = scmp.lt.s32.totalorder %s1251_s8, %s1251_s8 }
  0x21   : > { %p978_p0 = scmp.ne.s32.totalorder %s1251_s8, %s977_s7  ;;  %p986_p4 = scmp.lt.s32.totalorder %s977_s7, %s977_s7 }
  0x23   : > { %p980_p3 = pnand %p978_p0, %p966_p6  ;;  %p987_p10 = por %p986_p4, %p985_p8 }
  0x25   : > { %p981_p9 = pneg %p980_p3 }
  0x27   : > { %p988_p7 = pnand %p987_p10, %p981_p9 }
  0x29   : > { %991 = shalt.err (!%p988_p7)
}
  0x2a   : > { %s1144_s10 = smov 128   ;;  %s1145_s13 = smov 8  }
  0x2b   : > { %879 = dma.hbm_to_vmem [thread:$0]  (!%p1258_p1), %s1497_s0, 256, %s1251_s8, [#allocation4], %s1144_s10, %s1144_s10, %s1145_s13  }
  0x2c   : > { %s992_s25 = scalar_lea.hbm %s1498_s1, 512 }
  0x2d   : > { %p993_p3 = scmp.ne.s32.totalorder %s1498_s1, %s992_s25  ;;  %p999_p9 = scmp.lt.u32.totalorder %s992_s25, %s1498_s1 }
  0x2f   : > { %p995_p7 = pnand %p993_p3, %p966_p6 }
  0x31   : > { %p996_p8 = pneg %p995_p7 }
  0x33   : > { %p1001_p11 = pnand %p999_p9, %p996_p8 }
  0x35   : > { %1004 = shalt.err (!%p1001_p11)
}
  0x36   : > { %s1005_s8 = scalar_lea.vmem %s1268_s11, 512  ;;  %p1013_p4 = scmp.lt.s32.totalorder %s1268_s11, %s1268_s11 }
  0x37   : > { %p1006_p5 = scmp.ne.s32.totalorder %s1268_s11, %s1005_s8  ;;  %p1014_p10 = scmp.lt.s32.totalorder %s1005_s8, %s1005_s8 }
  0x39   : > { %p1008_p13 = pnand %p1006_p5, %p966_p6  ;;  %p1015_p3 = por %p1014_p10, %p1013_p4 }
  0x3b   : > { %p1009_p0 = pneg %p1008_p13 }
  0x3d   : > { %p1016_p7 = pnand %p1015_p3, %p1009_p0 }
  0x3f   : > { %1019 = shalt.err (!%p1016_p7)
}
  0x40   : > { %882 = dma.hbm_to_vmem [thread:$0]  (!%p1258_p1), %s1498_s1, 512, %s1268_s11, [#allocation7], %s1144_s10, %s1144_s10, %s1145_s13  }
  0x41   : > { %s29_s14 = sadd.s32 1, %s1136_s22  ;;  %s230_s15 = sand.u32 1, %s1140_s23  }
  0x42   : > { %p30_p6 = scmp.ge.s32.totalorder %s29_s14, 3  ;;  %s232_s16 = sand.u32 1, %s1128_s20  }
  0x43   : > { %s821_s17 = sshll.u32 %s1136_s22, 9  ;;  %s799_s9 = sshll.u32 %s232_s16, 7 }
  0x44   : > { %s1530_s14 = smov (%p30_p6, %s29_s14), 0  ;;  %s1331_s7 = scalar_lea.hbm %s1500_s3, %s821_s17 }
  0x45   : > { %s104_s11 = ssub.s32 %s1136_s22, %s1530_s14  ;;  %s234_s10 = scalar_lea.vmem [#allocation8], %s799_s9 }
  0x46   : > { %p105_p1 = scmp.eq.s32.totalorder %s104_s11, 0  ;;  %s241_s13 = sshll.u32 %s234_s10, 4  ;;  %s1335_s13 = int_to_ptr.vmem [resolvable:$true] %s241_s13 }
  0x47   : > { %s1515_s8 = sadd.s32 1, %s1128_s20  ;;  %s1342_s30 = scalar_lea.sflag [#allocation4], %s230_s15 }
  0x48   : > { %s1340_s26 = scalar_select %p105_p1, %s1128_s20, %s1515_s8  }
  0x49   : > { %s1020_s16 = scalar_lea.hbm %s1331_s7, 2048  ;;  %p1022_p9 = pneg %p1264_p2 }
  0x4a   : > { %p1021_p8 = scmp.ne.s32.totalorder %s1331_s7, %s1020_s16  ;;  %s1025_s9 = scalar_lea.hbm %s1500_s3, 6144 }
  0x4b   : > { %p1026_p13 = scmp.lt.u32.totalorder %s1331_s7, %s1500_s3  ;;  %p1027_p0 = scmp.lt.u32.totalorder %s1025_s9, %s1020_s16 }
  0x4c   : > { %p1023_p11 = pnand %p1022_p9, %p1021_p8  ;;  %p1029_p10 = scmp.lt.u32.totalorder %s1020_s16, %s1331_s7 }
  0x4d   : > { %p1028_p4 = por %p1027_p0, %p1026_p13 }
  0x4e   : > { %p1024_p5 = pneg %p1023_p11 }
  0x4f   : > { %p1030_p3 = por %p1029_p10, %p1028_p4 }
  0x51   : > { %p1031_p7 = pnand %p1030_p3, %p1024_p5 }
  0x53   : > { %1034 = shalt.err (!%p1031_p7)
}
  0x54   : > { %s1035_s15 = scalar_lea.vmem %s1335_s13, 2048  ;;  %s1146_s10 = smov [#allocation8]  }
  0x55   : > { %p1036_p6 = scmp.ne.s32.totalorder %s1335_s13, %s1035_s15  ;;  %s1040_s8 = sshll.u32 %s1146_s10, 4  ;;  %s1041_s8 = int_to_ptr.vmem [resolvable:$false] %s1040_s8 }
  0x56   : > { %s1042_s17 = scalar_lea.vmem %s1041_s8, 4096  ;;  %p1043_p11 = scmp.lt.s32.totalorder %s1335_s13, %s1041_s8 }
  0x57   : > { %p1038_p1 = pnand %p1036_p6, %p1022_p9  ;;  %p1044_p13 = scmp.lt.s32.totalorder %s1042_s17, %s1035_s15 }
  0x59   : > { %p1039_p8 = pneg %p1038_p1  ;;  %p1045_p0 = por %p1044_p13, %p1043_p11 }
  0x5b   : > { %p1046_p4 = pnand %p1045_p0, %p1039_p8 }
  0x5d   : > { %1049 = shalt.err (!%p1046_p4)
}
  0x5e   : > { %s1147_s16 = smov 1536   ;;  %s1148_s25 = smov 512  }
  0x5f   : > { %s1149_s9 = smov 32   ;;  %261 = sbr.rel (%p1247_p12) target bundleno = 920 (0x398), region = 40 }
  0x60   : > { %886 = dma.hbm_to_vmem [thread:$0]  (!%p1264_p2), %s1331_s7, 2048, %s1335_s13, %s1342_s30, %s1147_s16, %s1148_s25, %s1149_s9  }
  0x61   : > { %p1516_p9 = scmp.eq.s32.totalorder (!%p1247_p12), %s1216_s24, 0 }
  0x66   : > { %1103 = dma.done.wait (%p1516_p9), [#allocation4], 256   ;;  %p1517_p5 = pmov %p1516_p9 }
  0x68   : > { %1105 = vsyncadd (%p1517_p5), [#allocation4], 4294967040  ;;  %p1518_p10 = pmov %p1517_p5 }
  0x69   : > { %p1519_p3 = pmov %p1517_p5 }
  0x6a   : > { %1107 = dma.done.wait (%p1518_p10), [#allocation7], 512  }
  0x6b   : > { %1109 = vsyncadd (%p1519_p3), [#allocation7], 4294966784  ;;  %s271_s12 = sand.u32 1, %s1216_s24   ;;  %s1382_s7 = sand.u32 1, %s1124_s19  }
  0x6c   : > { %s805_s6 = sshll.u32 %s1382_s7, 7  ;;  %s272_s13 = scalar_lea.sflag [#allocation4], %s271_s12 }
  0x6d   : > { %s1385_s30 = scalar_lea.vmem [#allocation8], %s805_s6  ;;  %p1520_p12 = scmp.ne.s32.totalorder %s1508_s28, 0 }
  0x6f   : > { %1111 = dma.done.wait (%p1520_p12), %s272_s13, 2048  }
  0x70   : > { %1113 = vsyncadd (%p1520_p12), %s272_s13, 4294965248  ;;  %s806_s27 = sshll.u32 %s1382_s7, 6  ;;  %s807_s11 = sshll.u32 %s1132_s21, 2 }
  0x71   : > { %p309_p2 = scmp.lt.s32.totalorder %s807_s11, 11  ;;  %s1399_s8 = scalar_lea.vmem [#allocation9], %s806_s27 }
  0x72   : > { %p808_p7 = scmp.ne.s32.totalorder %s1132_s21, 0 }
  0x73   : > { %s1532_s11 = smov (!%p309_p2, %s807_s11), 11  ;;  %v321_v0 = vld [vmem:[#allocation6] sm:$0xff] (!%p808_p7)  ;;  %v322_v1 = vld [vmem:[#allocation6 + $0x8] sm:$0xff] (!%p808_p7)  ;;  %v323_v2 = vld [vmem:[#allocation6 + $0x10] sm:$0xff] (!%p808_p7)  ;;  %vm332_vm0 = vcmask (!%p808_p7), 261120  }
  0x74   : > { %s311_s10 = scalar_lea.vmem %s1501_s4, %s1532_s11  ;;  %318 = sbr.rel (%p808_p7) target bundleno = 672 (0x2a0), region = 56  ;;  %v840_v3 = vpack.c.bf16 (!%p808_p7), %v322_v1, %v321_v0  ;;  %v324_v4 = vld [vmem:[#allocation6 + $0x18] sm:$0xff] (!%p808_p7)  ;;  %v319_v5 = vld [vmem:[#allocation3] sm:$0xff] (!%p808_p7)  ;;  %v809_v8 = vld [vmem:[%s1499_s2] ss:$0 sm:$0xff] (!%p808_p7) }
  0x75   : > { %v844_v6 = vpack.c.bf16 (!%p808_p7), %v324_v4, %v323_v2  ;;  %837 = vmatprep.mubr.msk.f32.mxu0 (!%p808_p7), %vm332_vm0, %v319_v5  ;;  %v320_v7 = vld [vmem:[#allocation3 + $0x8] sm:$0xff] (!%p808_p7) }
  0x76   : > { %841 = vmatprep.subr.bf16.mxu0 (!%p808_p7), %v840_v3 }
  0x77   : > { %843 = vmatpush3.bf16.msra.mxu0 (!%p808_p7), %v840_v3 }
  0x78   : > { %845 = vmatprep.subr.bf16.mxu0 (!%p808_p7), %v844_v6 }
  0x7b   : > { %847 = vmatpush3.bf16.msra.mxu0 %v844_v6 }
  0x7e   : > { %838 = vmatmul.mubr.msk.f32.vlgmr.msra.gmra.mrb[0].mxu0 %vm332_vm0, %v320_v7 }
 0x151   : > { %v839_v9 = vpop.f32.mrb[0].mxu0 }
 0x152   : > { %v411_v10 = vadd.f32 %v839_v9, %v809_v8  ;;  %v405_v11 = vpop.f32.mrb[1].mxu0 }
 0x153   : > { %v406_v12 = vadd.f32 %v809_v8, %v405_v11 }
 0x154   : > { %v417_v13 = vmul.f32 0.70710677, %v411_v10  ;;  %v415_v20 = vmul.f32 0.5, %v411_v10 }
 0x155   : > { %v416_v14 = vmul.f32 0.70710677, %v406_v12  ;;  %v414_v17 = vmul.f32 0.5, %v406_v12 }
 0x156   : > { %956 = verf.f32 %v417_v13 }
 0x157   : > { %958 = verf.f32 %v416_v14 }
 0x160   : > { %v957_v15 = vpop.eup %956 }
 0x161   : > { %v959_v16 = vpop.eup %958  ;;  %v421_v19 = vadd.f32 1.0, %v957_v15 }
 0x162   : > { %v420_v18 = vadd.f32 1.0, %v959_v16 }
 0x163   : > { %v423_v23 = vmul.f32 %v421_v19, %v415_v20 }
 0x164   : > { %v422_v21 = vmul.f32 %v420_v18, %v414_v17 }
 0x165   : > { %v427_v24 = vsel %vm332_vm0, %v423_v23, 0.0 }
 0x166   : > { %v424_v22 = vsel %vm332_vm0, %v422_v21, 0.0 }
 0x167   : > { %425 = vadd.xlane.f32.xlu0 %v424_v22 }
 0x16b   : > { %428 = vadd.xlane.f32.xlu0 %v427_v24 }
 0x1f4   : > { %v426_v25 = vpop.xlane.xlu0 %425 }
 0x1f5   : > { %v431_v26 = vmul.f32 0.03125, %v426_v25 }
 0x1f7   : > { %v433_v27 = vsub.f32 %v422_v21, %v431_v26 }
 0x1f8   : > { %v429_v28 = vpop.xlane.xlu0 %428 }
 0x1f9   : > { %v432_v29 = vmul.f32 0.03125, %v429_v28  ;;  %v435_v30 = vmul.f32 %v433_v27, %v433_v27 }
 0x1fb   : > { %v434_v31 = vsub.f32 %v423_v23, %v432_v29  ;;  %v437_v32 = vsel %vm332_vm0, %v435_v30, 0.0 }
 0x1fc   : > { %438 = vadd.xlane.f32.xlu1 %v437_v32 }
 0x1fd   : > { %v436_v33 = vmul.f32 %v434_v31, %v434_v31 }
 0x1ff   : > { %v440_v34 = vsel %vm332_vm0, %v436_v33, 0.0 }
 0x200   : > { %441 = vadd.xlane.f32.xlu1 %v440_v34 }
 0x289   : > { %v439_v35 = vpop.xlane.xlu1 %438 }
 0x28a   : > { %v443_v36 = vmul.f32 0.03125, %v439_v35 }
 0x28c   : > { %v445_v37 = vadd.f32 1e-12, %v443_v36 }
 0x28d   : > { %v442_v38 = vpop.xlane.xlu1 %441 }
 0x28e   : > { %960 = vrsqrt.f32 %v445_v37  ;;  %v444_v39 = vmul.f32 0.03125, %v442_v38 }
 0x290   : > { %v446_v40 = vadd.f32 1e-12, %v444_v39 }
 0x292   : > { %962 = vrsqrt.f32 %v446_v40 }
 0x298   : > { %v961_v41 = vpop.eup %960 }
 0x299   : > { %v449_v42 = vmul.f32 %v961_v41, %v433_v27 }
 0x29b   : > { %451 = vst.msk [vmem:[#allocation2] sm:$0xff] %vm332_vm0, %v449_v42 }
 0x29c   : > { %v963_v43 = vpop.eup %962 }
 0x29d   : > { %v450_v44 = vmul.f32 %v963_v43, %v434_v31 }
 0x29f   : > { %452 = vst.msk [vmem:[#allocation2 + $0x8] sm:$0xff] %vm332_vm0, %v450_v44 }
 0x2a0 PF: > { %v456_v45 = vld [vmem:[%s1385_s30 + $0x8] sm:$0xff]  ;;  %v458_v47 = vld [vmem:[%s1385_s30 + $0x18] sm:$0xff]  ;;  %v455_v50 = vld [vmem:[%s1385_s30] sm:$0xff]  ;;  %v1150_v52 = vmov 0.0   ;;  %vm493_vm1 = vcmask 261120   ;;  %v473_v8 = vlaneseq  ;;  %s822_s9 = sshll.u32 %s1132_s21, 9 }
 0x2a1   : > { %v460_v46 = vld [vmem:[%s1385_s30 + $0x28] sm:$0xff]  ;;  %v462_v49 = vld [vmem:[%s1385_s30 + $0x38] sm:$0xff]  ;;  %v459_v51 = vld [vmem:[%s1385_s30 + $0x20] sm:$0xff]  ;;  %564 = vmatprep.mubr.f32.mxu0 %v1150_v52  ;;  %641 = vmatprep.mubr.f32.mxu1 %v1150_v52  ;;  %s679_s12 = sshll.u32 %s1399_s8, 4  ;;  %s1443_s21 = scalar_lea.hbm %s1502_s5, %s822_s9  ;;  %s1445_s12 = int_to_ptr.vmem [resolvable:$true] %s679_s12 }
 0x2a2   : > { %v848_v48 = vpack.c.bf16 %v460_v46, %v456_v45  ;;  %v856_v53 = vpack.c.bf16 %v462_v49, %v458_v47  ;;  %v850_v54 = vpack.c.bf16 %v459_v51, %v455_v50  ;;  %v457_v55 = vld [vmem:[%s1385_s30 + $0x10] sm:$0xff]  ;;  %v464_v57 = vld [vmem:[%s1385_s30 + $0x48] sm:$0xff]  ;;  %v466_v60 = vld [vmem:[%s1385_s30 + $0x58] sm:$0xff]  ;;  %v474_v9 = vshrl.u32 %v473_v8, 7  ;;  %s1050_s27 = scalar_lea.vmem %s1445_s12, 1024  ;;  %p1521_p1 = scmp.ne.s32.totalorder %s1509_s29, 0 }
 0x2a3   : > { %v461_v56 = vld [vmem:[%s1385_s30 + $0x30] sm:$0xff]  ;;  %v468_v59 = vld [vmem:[%s1385_s30 + $0x68] sm:$0xff]  ;;  %v470_v61 = vld [vmem:[%s1385_s30 + $0x78] sm:$0xff]  ;;  %p1051_p6 = scmp.ne.s32.totalorder %s1445_s12, %s1050_s27  ;;  %s1151_s11 = smov [#allocation9]  }
 0x2a4   : > { %849 = vmatprep.subr.bf16.mxu0 %v848_v48  ;;  %v858_v58 = vpack.c.bf16 %v461_v56, %v457_v55  ;;  %857 = vmatprep.subr.bf16.mxu1 %v856_v53  ;;  %v852_v62 = vpack.c.bf16 %v468_v59, %v464_v57  ;;  %v860_v63 = vpack.c.bf16 %v470_v61, %v466_v60  ;;  %v463_v0 = vld [vmem:[%s1385_s30 + $0x40] sm:$0xff]  ;;  %v465_v2 = vld [vmem:[%s1385_s30 + $0x50] sm:$0xff]  ;;  %v475_v10 = vsub.s32 0, %v474_v9  ;;  %s1054_s24 = sshll.u32 %s1151_s11, 4  ;;  %s1055_s24 = int_to_ptr.vmem [resolvable:$false] %s1054_s24 }
 0x2a5   : > { %851 = vmatpush1.bf16.msra.mxu0 %v850_v54  ;;  %v467_v1 = vld [vmem:[%s1385_s30 + $0x60] sm:$0xff]  ;;  %v469_v4 = vld [vmem:[%s1385_s30 + $0x70] sm:$0xff]  ;;  %v483_v12 = vsub.s32 2, %v474_v9  ;;  %v479_v13 = vsub.s32 1, %v474_v9  ;;  %v487_v14 = vsub.s32 3, %v474_v9  ;;  %s663_s30 = scalar_lea.sflag [#allocation5], %s1382_s7  ;;  %p1052_p8 = pnand %p1051_p6, %p1521_p1 }
 0x2a6   : > { %859 = vmatpush1.bf16.msra.mxu1 %v858_v58  ;;  %v854_v3 = vpack.c.bf16 %v467_v1, %v463_v0  ;;  %853 = vmatprep.subr.bf16.mxu0 %v852_v62  ;;  %v862_v5 = vpack.c.bf16 %v469_v4, %v465_v2  ;;  %v453_v6 = vld [vmem:[#allocation2] sm:$0xff]  ;;  %v454_v7 = vld [vmem:[#allocation2 + $0x8] sm:$0xff]  ;;  %s1056_s15 = scalar_lea.vmem %s1055_s24, 2048  ;;  %p1057_p13 = scmp.lt.s32.totalorder %s1445_s12, %s1055_s24 }
 0x2a7   : > { %861 = vmatprep.subr.bf16.mxu1 %v860_v63  ;;  %v471_v11 = vld [vmem:[%s311_s10] sm:$0xf]  ;;  %p1053_p11 = pneg %p1052_p8  ;;  %p1058_p0 = scmp.lt.s32.totalorder %s1056_s15, %s1050_s27 }
 0x2a8   : > { %v476_v15 = vrot.slane %v471_v11, %v475_v10  ;;  %v484_v16 = vrot.slane %v471_v11, %v483_v12  ;;  %v480_v17 = vrot.slane %v471_v11, %v479_v13  ;;  %v488_v18 = vrot.slane %v471_v11, %v487_v14 }
 0x2a9   : > { %855 = vmatpush1.bf16.msra.mxu0 %v854_v3  ;;  %p1059_p4 = por %p1058_p0, %p1057_p13 }
 0x2aa   : > { %863 = vmatpush1.bf16.msra.mxu1 %v862_v5 }
 0x2ab   : > { %p1060_p9 = pnand %p1059_p4, %p1053_p11 }
 0x2ac   : > { %812 = vmatmul.mubr.msk.f32.vlgmr.msra.gmra.mrb[0].mxu0 %vm493_vm1, %v453_v6 }
 0x2ad   : > { %814 = vmatmul.mubr.msk.f32.vlgmr.msra.gmra.mrb[0].mxu1 %vm493_vm1, %v453_v6  ;;  %570 = vmatprep.mubr.f32.mxu0 %v1150_v52 }
 0x2ae   : > { %647 = vmatprep.mubr.f32.mxu1 %v1150_v52 }
 0x2b0   : > { %813 = vmatmul.mubr.msk.f32.gmra.mrb[2].mxu0 %vm493_vm1, %v454_v7 }
 0x2b1   : > { %815 = vmatmul.mubr.msk.f32.gmra.mrb[2].mxu1 %vm493_vm1, %v454_v7 }
 0x37f   : > { %v566_v19 = vpop.f32.mrb[0].mxu0 }
 0x380   : > { %v567_v20 = vadd.f32 %v566_v19, %v476_v15  ;;  %v643_v21 = vpop.f32.mrb[0].mxu1  ;;  %v568_v22 = vpop.f32.mrb[1].mxu0 }
 0x381   : > { %v644_v23 = vadd.f32 %v643_v21, %v484_v16  ;;  %v569_v24 = vadd.f32 %v568_v22, %v480_v17  ;;  %v645_v25 = vpop.f32.mrb[1].mxu1 }
 0x382   : > { %654 = vst [vmem:[%s1399_s8] sm:$0xff] %v567_v20  ;;  %v646_v26 = vadd.f32 %v645_v25, %v488_v18 }
 0x383   : > { %656 = vst [vmem:[%s1399_s8 + $0x10] sm:$0xff] %v644_v23  ;;  %655 = vst [vmem:[%s1399_s8 + $0x8] sm:$0xff] %v569_v24  ;;  %v572_v27 = vpop.f32.mrb[2].mxu0 }
 0x384   : > { %657 = vst [vmem:[%s1399_s8 + $0x18] sm:$0xff] %v646_v26  ;;  %v573_v28 = vadd.f32 %v572_v27, %v476_v15  ;;  %v649_v29 = vpop.f32.mrb[2].mxu1  ;;  %v574_v30 = vpop.f32.mrb[3].mxu0 }
 0x385   : > { %v650_v31 = vadd.f32 %v649_v29, %v484_v16  ;;  %v575_v32 = vadd.f32 %v574_v30, %v480_v17  ;;  %v651_v33 = vpop.f32.mrb[3].mxu1 }
 0x386   : > { %658 = vst [vmem:[%s1399_s8 + $0x20] sm:$0xff] %v573_v28  ;;  %v652_v34 = vadd.f32 %v651_v33, %v488_v18 }
 0x387   : > { %660 = vst [vmem:[%s1399_s8 + $0x30] sm:$0xff] %v650_v31  ;;  %659 = vst [vmem:[%s1399_s8 + $0x28] sm:$0xff] %v575_v32 }
 0x388   : > { %661 = vst [vmem:[%s1399_s8 + $0x38] sm:$0xff] %v652_v34 }
 0x389   : > { %1063 = shalt.err (!%p1060_p9)
}
 0x38a   : > { %s1064_s10 = scalar_lea.hbm %s1443_s21, 1024  ;;  %s1068_s17 = scalar_lea.hbm %s1502_s5, 3072 }
 0x38b   : > { %p1065_p5 = scmp.ne.s32.totalorder %s1443_s21, %s1064_s10  ;;  %p1069_p12 = scmp.lt.u32.totalorder %s1443_s21, %s1502_s5 }
 0x38c   : > { %p1070_p2 = scmp.lt.u32.totalorder %s1068_s17, %s1064_s10  ;;  %p1072_p6 = scmp.lt.u32.totalorder %s1064_s10, %s1443_s21 }
 0x38d   : > { %p1066_p10 = pnand %p1065_p5, %p1521_p1 }
 0x38e   : > { %p1071_p7 = por %p1070_p2, %p1069_p12 }
 0x38f   : > { %p1067_p3 = pneg %p1066_p10 }
 0x390   : > { %p1073_p8 = por %p1072_p6, %p1071_p7 }
 0x392   : > { %p1074_p11 = pnand %p1073_p8, %p1067_p3 }
 0x394   : > { %1077 = shalt.err (!%p1074_p11)
}
 0x395   : > { %s1152_s9 = smov 512   ;;  %s1153_s6 = smov 1536  }
 0x396   : > { %s1154_s13 = smov 32  }
 0x397   : > { %874 = dma.vmem_to_hbm [thread:$0]  (%p1521_p1), %s1445_s12, 1024, %s1443_s21, %s663_s30, %s1152_s9, %s1153_s6, %s1154_s13  }
 0x398 PF: > { %s1522_s27 = sld [smem:[#allocation14_spill]]  ;;  %p896_p13 = scmp.ge.s32.totalorder %s1140_s23, 2 }
 0x399   : > { %s694_s11 = sand.u32 1, %s1120_s18  }
 0x39a   : > { %s695_s24 = scalar_lea.sflag [#allocation5], %s694_s11 }
 0x39e   : > { %p1523_p0 = scmp.ne.s32.totalorder %s1522_s27, 0 }
 0x3a0   : > { %p888_p4 = pnand %p896_p13, %p1523_p0 }
 0x3a2   : > { %1115 = dma.done.wait (!%p888_p4), %s695_s24, 1024  }
 0x3a3   : > { %1117 = vsyncadd (!%p888_p4), %s695_s24, 4294966272  ;;  %s20_s23 = sadd.s32 1, %s1140_s23   ;;  %s1524_s18 = smov %s1124_s19 }
 0x3a4   : > { %p17_p9 = scmp.ge.s32.totalorder %s20_s23, 5   ;;  %s1525_s19 = smov %s1128_s20 }
 0x3a5   : > { %s1526_s20 = smov %s1340_s26  ;;  %s1527_s21 = smov %s1136_s22 }
 0x3a6   : > { %s1528_s22 = smov %s1530_s14  ;;  %19 = sbr.rel (!%p17_p9) target bundleno = 6 (0x6), region = 100 }
 0x3ad   :  { %700 = vsyncpa [#allocation4], 1 }
 0x3ae   :  { %702 = vsyncpa [#allocation4 + $0x1], 1 }
 0x3af   :  { %703 = vsyncpa [#allocation7], 1 }
 0x3b0   :  { %704 = vsyncpa [#allocation5], 1 }
 0x3b1   :  { %706 = vsyncpa [#allocation5 + $0x1], 1 }

</bundles_post_ra>
